<compile_context>
chip_gen: v7x
topology: tpu7x:2x2x1
jax: 0.10.0
libtpu: 0.0.40
codegen_flags: <defaults>
</compile_context>

<pallas_src>
import math

import jax
import jax.numpy as jnp
from jax.experimental import pallas as pl
from jax.experimental.pallas import tpu as pltpu

NUM_HEADS = 4
MAX_SEQ_LEN = 1024


def _round_up(n, m):
    return ((n + m - 1) // m) * m


def _pick_tile(n, max_tile):
    """Largest divisor of n that is <= max_tile and sublane friendly (mult of 8 or == n)."""
    # TODO(synk): pathological (large, prime-ish) n still falls back to a full-dim
    # block; a cdiv grid with masked key tails would be needed to avoid that.
    for c in range(min(n, max_tile), 0, -1):
        if n % c == 0 and (c % 8 == 0 or c == n):
            return c
    return n


def _auto_config():
    """(q_block, vmem_limit_bytes) derived from the local TPU generation."""
    try:
        cap = int(getattr(pltpu.get_tpu_info(), "vmem_capacity_bytes",
                          128 * 1024 * 1024))
    except Exception:
        cap = 128 * 1024 * 1024
    if cap <= 80 * 1024 * 1024:                 # v7x-class: 64 MiB per TensorCore
        return 128, 40 * 1024 * 1024
    return 512, 64 * 1024 * 1024                # v5e / v6e: 128 MiB


def _bspec(block, index_map, single_buffer=False):
    if single_buffer:
        return pl.BlockSpec(block, index_map,
                            pipeline_mode=pl.Buffered(buffer_count=1))
    return pl.BlockSpec(block, index_map)


# ---------------------------------------------------------------------------
# Kernel 1: fused QKV projection, single lane-dense (TM, 3H) output per step.
# ---------------------------------------------------------------------------
def _make_qkv_kernel(compute_dtype):
    def kernel(x_ref, w_ref, b_ref, y_ref):
        x = x_ref[...].astype(compute_dtype)                       # (TM, H)
        y = jnp.dot(x, w_ref[...],
                    preferred_element_type=jnp.float32) + b_ref[...]
        y_ref[...] = y.astype(y_ref.dtype)                         # dense (TM, 3H) store

    return kernel


def _qkv_call(bs_pad, H, tm, cdt, vmem_limit, single_buffer):
    return pl.pallas_call(
        _make_qkv_kernel(cdt),
        out_shape=jax.ShapeDtypeStruct((bs_pad, 3 * H), cdt),
        grid=(bs_pad // tm,),
        in_specs=[
            pl.BlockSpec((tm, H), lambda m: (m, 0)),
            _bspec((H, 3 * H), lambda m: (0, 0), single_buffer),
            _bspec((1, 3 * H), lambda m: (0, 0), single_buffer),
        ],
        out_specs=pl.BlockSpec((tm, 3 * H), lambda m: (m, 0)),
        compiler_params=pltpu.CompilerParams(
            dimension_semantics=("parallel",),
            vmem_limit_bytes=vmem_limit),
    )


# ---------------------------------------------------------------------------
# Kernel 2: attention (content + relative-position scores, softmax, renorm,
# attn @ V) + output projection, per (batch, query-tile) grid step.
# ---------------------------------------------------------------------------
def _make_attn_kernel(S, H, num_heads, q_tile, compute_dtype):
    dh = H // num_heads
    n_bits = (q_tile - 1).bit_length()     # bits for per-row shifts in [0, TQ-1]

    def kernel(q_ref, k_ref, v_ref, rel_ref, wo_ref, bo_ref, o_ref):
        relw = rel_ref[0]                                           # (Wp, dh)

        # Head-independent per-row left-shift amounts and per-bit masks (hoisted).
        row = jax.lax.broadcasted_iota(jnp.int32, (q_tile, 1), 0)
        t_shift = (q_tile - 1) - row                                # (TQ, 1) in [0, TQ-1]
        bit_masks = [(t_shift & (1 << b)) != 0 for b in range(n_bits)]

        acc = None
        for h in range(num_heads):                                  # nh is small & static
            qh = q_ref[0, 0, h]                                     # (TQ, dh)
            kh = k_ref[0, 0, h]                                     # (S,  dh)
            vh = v_ref[0, 0, h]                                     # (S,  dh)

            # Content scores on the MXU (1/sqrt(dh) folded into Wk in the wrapper).
            scores = jax.lax.dot_general(
                qh, kh, (((1,), (1,)), ((), ())),
                preferred_element_type=jnp.float32)                 # (TQ, S)
            scores = jnp.clip(scores, -100000.0, 100000.0)

            # Relative-position scores, Shaw/skew form: one MXU matmul against the
            # per-tile window, then a shrinking barrel shifter (masks hoisted above):
            #   band[i, j] = q[i] . rel_emb[row_i - j + M - 1]
            band = jax.lax.dot_general(
                qh, relw, (((1,), (1,)), ((), ())),
                preferred_element_type=jnp.float32)                 # (TQ, Wp)
            for b in reversed(range(n_bits)):
                amt = 1 << b
                nxt = S + amt - 1
                band = jnp.where(bit_masks[b],
                                 band[:, amt:amt + nxt], band[:, :nxt])
            band = band[:, :S]
            scores = scores + band

            # Softmax + the module's extra renormalization fused into a single
            # (TQ, S) multiply; divisions only on (TQ, 1) denominators.
            m = jnp.max(scores, axis=-1, keepdims=True)
            e = jnp.exp(scores - m)
            s = jnp.sum(e, axis=-1, keepdims=True)
            r1 = pl.reciprocal(s, approx=False)
            r2 = pl.reciprocal(s * r1 + 1e-8, approx=False)
            attn = e * (r1 * r2)
            # attn_mask is all-ones in the module (no-op).
            # TODO(synk): training-mode dropout on attn is not implemented (eval mode).

            ctx = jnp.dot(attn.astype(compute_dtype), vh,
                          preferred_element_type=jnp.float32)       # (TQ, dh)
            part = jnp.dot(ctx.astype(compute_dtype),
                           wo_ref[h * dh:(h + 1) * dh, :],
                           preferred_element_type=jnp.float32)      # (TQ, H)
            acc = part if acc is None else acc + part

        o_ref[0] = (acc + bo_ref[...]).astype(o_ref.dtype)          # dense (TQ, H) store

    return kernel


def _attn_call(B, S, H, nh, dh, TQ, Wp, cdt, out_dtype, vmem_limit, single_buffer):
    T = S // TQ
    return pl.pallas_call(
        _make_attn_kernel(S, H, nh, TQ, cdt),
        out_shape=jax.ShapeDtypeStruct((B, S, H), out_dtype),
        grid=(B, T),
        in_specs=[
            pl.BlockSpec((1, 1, nh, TQ, dh), lambda b, t: (0, b, 0, t, 0)),     # q tile
            _bspec((1, 1, nh, S, dh), lambda b, t: (1, b, 0, 0, 0), single_buffer),  # k
            _bspec((1, 1, nh, S, dh), lambda b, t: (2, b, 0, 0, 0), single_buffer),  # v
            pl.BlockSpec((1, Wp, dh), lambda b, t: (t, 0, 0)),                  # rel window
            _bspec((H, H), lambda b, t: (0, 0), single_buffer),                 # Wo
            _bspec((1, H), lambda b, t: (0, 0), single_buffer),                 # bo
        ],
        out_specs=pl.BlockSpec((1, TQ, H), lambda b, t: (b, t, 0)),
        compiler_params=pltpu.CompilerParams(
            dimension_semantics=("parallel", "parallel"),
            vmem_limit_bytes=vmem_limit),
    )


# ---------------------------------------------------------------------------
# Wrapper
# ---------------------------------------------------------------------------
def enhanced_mha(x, params, *, num_heads=NUM_HEADS, max_seq_len=MAX_SEQ_LEN,
                 compute_dtype=jnp.bfloat16, q_block=None, row_block=1024):
    """x: (B, S, H).  Weights stored as (in, out) so y = x @ W + b (== PyTorch x @ W.T + b)."""
    B, S, H = x.shape
    assert H % num_heads == 0
    # TODO(synk): the module skips rel-pos when seq_len > max_seq_len; not implemented here.
    assert S <= max_seq_len
    nh = num_heads
    dh = H // nh
    M = max_seq_len
    cdt = jnp.dtype(compute_dtype)
    f32 = jnp.float32

    auto_q_block, vmem_limit = _auto_config()
    if q_block is None:
        q_block = auto_q_block

    # Fold the content-score scale 1/sqrt(dh) into Wk/bk (rel-pos scores stay unscaled).
    scale = 1.0 / math.sqrt(dh)
    wqkv = jnp.concatenate(
        [params["wq"], params["wk"] * scale, params["wv"]], axis=1).astype(cdt)
    bqkv = jnp.concatenate(
        [params["bq"], params["bk"] * scale, params["bv"]], axis=1).astype(f32)
    wo = params["wo"].astype(cdt)
    bo = params["bo"].astype(f32)

    # ---- Kernel 1: fused QKV projection over B*S rows (padded to the row tile) ----
    BS = B * S
    TM = min(row_block, _round_up(BS, 8))
    BS_pad = _round_up(BS, TM)
    x2 = x.reshape(BS, H)
    if BS_pad != BS:
        x2 = jnp.pad(x2, ((0, BS_pad - BS), (0, 0)))
    try:
        y = _qkv_call(BS_pad, H, TM, cdt, vmem_limit, True)(x2, wqkv, bqkv)
    except Exception:   # pl.Buffered(1) unsupported on this jax version -> default buffering
        y = _qkv_call(BS_pad, H, TM, cdt, vmem_limit, False)(x2, wqkv, bqkv)
    if BS_pad != BS:
        y = y[:BS]

    # (B, S, 3, nh, dh) -> (3, B, nh, S, dh): head-major layout so every per-head
    # access in kernel 2 is a leading-dim index (no masked lane slicing when dh < 128).
    qkv_t = y.reshape(B, S, 3, nh, dh).transpose(2, 0, 3, 1, 4)

    # ---- Per-query-tile relative-position windows (Shaw skew, width S + TQ - 1) ----
    # window_t[c] = rel_emb[M - 1 + q0 + TQ - 1 - c], so the in-kernel left shift per
    # local row i is (TQ - 1 - i), independent of the tile index.
    TQ = _pick_tile(S, q_block)
    T = S // TQ
    n_bits = (TQ - 1).bit_length()
    Wt = S + TQ - 1
    Wp = _round_up(max(Wt, S + (1 << n_bits) - 1), 128)   # lane-dense, shifter-safe
    rel = params["rel_emb"]
    wins = []
    for t in range(T):
        q0 = t * TQ
        wins.append(jnp.flip(rel[M + q0 - S: M + q0 + TQ - 1, :], axis=0))
    relw = jnp.stack(wins, axis=0)                                   # (T, Wt, dh)
    relw = jnp.pad(relw, ((0, 0), (0, Wp - Wt), (0, 0))).astype(cdt)

    # ---- Kernel 2: attention + output projection, grid over (batch, query tile) ----
    args = (qkv_t, qkv_t, qkv_t, relw, wo, bo)
    try:
        out = _attn_call(B, S, H, nh, dh, TQ, Wp, cdt, x.dtype, vmem_limit, True)(*args)
    except Exception:   # pl.Buffered(1) unsupported -> default double buffering
        out = _attn_call(B, S, H, nh, dh, TQ, Wp, cdt, x.dtype, vmem_limit, False)(*args)
    return out


def _reference(x, params, num_heads=NUM_HEADS, max_seq_len=MAX_SEQ_LEN):
    """Pure-JAX reference mirroring the PyTorch forward (eval mode)."""
    B, S, H = x.shape
    nh = num_heads
    dh = H // nh
    q = (x @ params["wq"] + params["bq"][0]).reshape(B, S, nh, dh).transpose(0, 2, 1, 3)
    k = (x @ params["wk"] + params["bk"][0]).reshape(B, S, nh, dh).transpose(0, 2, 1, 3)
    v = (x @ params["wv"] + params["bv"][0]).reshape(B, S, nh, dh).transpose(0, 2, 1, 3)
    scores = jnp.einsum("bhid,bhjd->bhij", q, k) / math.sqrt(dh)
    scores = jnp.clip(scores, -100000.0, 100000.0)
    idx = jnp.arange(S)[:, None] - jnp.arange(S)[None, :] + max_seq_len - 1
    rel = params["rel_emb"][idx]                                # (S, S, dh)
    scores = scores + jnp.einsum("bhid,ijd->bhij", q, rel)
    attn = jax.nn.softmax(scores, axis=-1)
    attn = attn / (attn.sum(-1, keepdims=True) + 1e-8)
    ctx = jnp.einsum("bhij,bhjd->bhid", attn, v)
    ctx = ctx.transpose(0, 2, 1, 3).reshape(B, S, H)
    return ctx @ params["wo"] + params["bo"][0]


if __name__ == "__main__":
    B, S, H = 2, 8, 32
    dh = H // NUM_HEADS

    key = jax.random.PRNGKey(0)
    ks = jax.random.split(key, 10)

    def xavier(k, shape):
        limit = math.sqrt(6.0 / (shape[0] + shape[1]))
        return jax.random.uniform(k, shape, jnp.float32, -limit, limit)

    params = {
        "wq": xavier(ks[0], (H, H)), "bq": 0.01 * jax.random.normal(ks[1], (1, H), jnp.float32),
        "wk": xavier(ks[2], (H, H)), "bk": 0.01 * jax.random.normal(ks[3], (1, H), jnp.float32),
        "wv": xavier(ks[4], (H, H)), "bv": 0.01 * jax.random.normal(ks[5], (1, H), jnp.float32),
        "wo": xavier(ks[6], (H, H)), "bo": 0.01 * jax.random.normal(ks[7], (1, H), jnp.float32),
        "rel_emb": xavier(ks[8], (2 * MAX_SEQ_LEN - 1, dh)),
    }
    x = jax.random.normal(ks[9], (B, S, H), jnp.float32)

    ref = _reference(x, params)

    # f32 compute path — tight check against the pure-JAX reference.
    out = enhanced_mha(x, params, compute_dtype=jnp.float32)
    out = jax.block_until_ready(out)
    assert out.shape == (B, S, H)
    assert jnp.allclose(out, ref, atol=2e-4, rtol=2e-4), "f32 kernel mismatch vs reference"

    # Default path: bf16 MXU feed / bf16 q,k,v storage (f32 accumulation) — looser tolerance.
    out_bf16 = enhanced_mha(x, params)
    out_bf16 = jax.block_until_ready(out_bf16)
    assert jnp.allclose(out_bf16, ref, atol=1e-1, rtol=1e-1), "bf16 kernel mismatch vs reference"

    print("KERNEL_OK")
</pallas_src>

<mosaic_0001>
module attributes {stable_mosaic.version = 11 : i64} {
  func.func @kernel(%arg0: i32, %arg1: memref<16x32xf32, #tpu.memory_space<vmem>>, %arg2: memref<32x96xf32, #tpu.memory_space<vmem>>, %arg3: memref<1x96xf32, #tpu.memory_space<vmem>>, %arg4: memref<16x96xf32, #tpu.memory_space<vmem>>) attributes {dimension_semantics = [#tpu.dimension_semantics<parallel>], iteration_bounds = array<i64: 1>, scalar_prefetch = 0 : i64, scratch_operands = 0 : i64, tpu.core_type = #tpu.core_type<tc>, window_params = [{transform_indices = @transform_0, window_bounds = array<i64: 16, 32>}, {pipeline_mode = #tpu.pipeline_mode<synchronous>, transform_indices = @transform_1, window_bounds = array<i64: 32, 96>}, {pipeline_mode = #tpu.pipeline_mode<synchronous>, transform_indices = @transform_2, window_bounds = array<i64: 1, 96>}, {transform_indices = @transform_3, window_bounds = array<i64: 16, 96>}]} {
    %c0 = arith.constant 0 : index
    %c0_0 = arith.constant 0 : index
    %0 = vector.load %arg1[%c0, %c0_0] : memref<16x32xf32, #tpu.memory_space<vmem>>, vector<16x32xf32>
    %c0_1 = arith.constant 0 : index
    %c0_2 = arith.constant 0 : index
    %1 = vector.load %arg2[%c0_1, %c0_2] : memref<32x96xf32, #tpu.memory_space<vmem>>, vector<32x96xf32>
    %cst = arith.constant dense<0.000000e+00> : vector<16x96xf32>
    %2 = tpu.matmul %0, %1, %cst {dimension_numbers = #tpu.dot_dimension_numbers<[1], [0], [0], [1], [0, 0, 1, 1], [], []>} : vector<16x32xf32>, vector<32x96xf32>, vector<16x96xf32> -> vector<16x96xf32>
    %c0_3 = arith.constant 0 : index
    %c0_4 = arith.constant 0 : index
    %3 = vector.load %arg3[%c0_3, %c0_4] : memref<1x96xf32, #tpu.memory_space<vmem>>, vector<1x96xf32>
    %4 = vector.broadcast %3 : vector<1x96xf32> to vector<16x96xf32>
    %5 = arith.addf %2, %4 : vector<16x96xf32>
    %c0_5 = arith.constant 0 : index
    %c0_6 = arith.constant 0 : index
    %6 = vector.load %arg4[%c0_5, %c0_6] : memref<16x96xf32, #tpu.memory_space<vmem>>, vector<16x96xf32>
    tpu.vector_store %arg4[%c0_5, %c0_6], %5 {strides = array<i32>} : memref<16x96xf32, #tpu.memory_space<vmem>>, vector<16x96xf32>,
    return
  }
  func.func @transform_0(%arg0: i32) -> (i32, i32) {
    %c0_i32 = arith.constant 0 : i32
    %c0_i32_0 = arith.constant 0 : i32
    return %arg0, %c0_i32 : i32, i32
  }
  func.func @transform_1(%arg0: i32) -> (i32, i32) {
    %c0_i32 = arith.constant 0 : i32
    %c0_i32_0 = arith.constant 0 : i32
    %c0_i32_1 = arith.constant 0 : i32
    return %c0_i32, %c0_i32_0 : i32, i32
  }
  func.func @transform_2(%arg0: i32) -> (i32, i32) {
    %c0_i32 = arith.constant 0 : i32
    %c0_i32_0 = arith.constant 0 : i32
    %c0_i32_1 = arith.constant 0 : i32
    return %c0_i32, %c0_i32_0 : i32, i32
  }
  func.func @transform_3(%arg0: i32) -> (i32, i32) {
    %c0_i32 = arith.constant 0 : i32
    %c0_i32_0 = arith.constant 0 : i32
    return %arg0, %c0_i32 : i32, i32
  }
}

module attributes {stable_mosaic.version = 11 : i64} {
  func.func @kernel(%arg0: i32, %arg1: memref<16x32xf32, #tpu.memory_space<vmem>>, %arg2: memref<32x96xf32, #tpu.memory_space<vmem>>, %arg3: memref<1x96xf32, #tpu.memory_space<vmem>>, %arg4: memref<16x96xf32, #tpu.memory_space<vmem>>) attributes {dimension_semantics = [#tpu.dimension_semantics<parallel>], iteration_bounds = array<i64: 1>, scalar_prefetch = 0 : i64, scratch_operands = 0 : i64, tpu.core_type = #tpu.core_type<tc>, window_params = [{transform_indices = @transform_0, window_bounds = array<i64: 16, 32>}, {pipeline_mode = #tpu.pipeline_mode<synchronous>, transform_indices = @transform_1, window_bounds = array<i64: 32, 96>}, {pipeline_mode = #tpu.pipeline_mode<synchronous>, transform_indices = @transform_2, window_bounds = array<i64: 1, 96>}, {transform_indices = @transform_3, window_bounds = array<i64: 16, 96>}]} {
    %c0 = arith.constant 0 : index
    %c0_0 = arith.constant 0 : index
    %0 = vector.load %arg1[%c0, %c0_0] : memref<16x32xf32, #tpu.memory_space<vmem>>, vector<16x32xf32>
    %c0_1 = arith.constant 0 : index
    %c0_2 = arith.constant 0 : index
    %1 = vector.load %arg2[%c0_1, %c0_2] : memref<32x96xf32, #tpu.memory_space<vmem>>, vector<32x96xf32>
    %cst = arith.constant dense<0.000000e+00> : vector<16x96xf32>
    %2 = tpu.matmul %0, %1, %cst {dimension_numbers = #tpu.dot_dimension_numbers<[1], [0], [0], [1], [0, 0, 1, 1], [], []>} : vector<16x32xf32>, vector<32x96xf32>, vector<16x96xf32> -> vector<16x96xf32>
    %c0_3 = arith.constant 0 : index
    %c0_4 = arith.constant 0 : index
    %3 = vector.load %arg3[%c0_3, %c0_4] : memref<1x96xf32, #tpu.memory_space<vmem>>, vector<1x96xf32>
    %4 = vector.broadcast %3 : vector<1x96xf32> to vector<16x96xf32>
    %5 = arith.addf %2, %4 : vector<16x96xf32>
    %c0_5 = arith.constant 0 : index
    %c0_6 = arith.constant 0 : index
    %6 = vector.load %arg4[%c0_5, %c0_6] : memref<16x96xf32, #tpu.memory_space<vmem>>, vector<16x96xf32>
    tpu.vector_store %arg4[%c0_5, %c0_6], %5 {strides = array<i32>} : memref<16x96xf32, #tpu.memory_space<vmem>>, vector<16x96xf32>,
    return
  }
  func.func @transform_0(%arg0: i32) -> (i32, i32) {
    %c0_i32 = arith.constant 0 : i32
    %c0_i32_0 = arith.constant 0 : i32
    return %arg0, %c0_i32 : i32, i32
  }
  func.func @transform_1(%arg0: i32) -> (i32, i32) {
    %c0_i32 = arith.constant 0 : i32
    %c0_i32_0 = arith.constant 0 : i32
    %c0_i32_1 = arith.constant 0 : i32
    return %c0_i32, %c0_i32_0 : i32, i32
  }
  func.func @transform_2(%arg0: i32) -> (i32, i32) {
    %c0_i32 = arith.constant 0 : i32
    %c0_i32_0 = arith.constant 0 : i32
    %c0_i32_1 = arith.constant 0 : i32
    return %c0_i32, %c0_i32_0 : i32, i32
  }
  func.func @transform_3(%arg0: i32) -> (i32, i32) {
    %c0_i32 = arith.constant 0 : i32
    %c0_i32_0 = arith.constant 0 : i32
    return %arg0, %c0_i32 : i32, i32
  }
}

</mosaic_0001>

<bundles_post_ra>
// kernel: tpu_custom_call.1
= control target key start
LH: loop header
LB: loop body
LE: loop exit
PB: predicated region body
PF: predicated region fallthrough
CT: control target
= control target key end

     0   :  { %8 = vsyncpa [#allocation3], 0  ;;  %s388_s0 = inlined_call_operand.hbm [shape: f32[16,32], index: 0, kind: input, shape index: {}]   ;;  %s389_s1 = inlined_call_operand.hbm [shape: f32[32,96], index: 1, kind: input, shape index: {}]   ;;  %s390_s2 = inlined_call_operand.hbm [shape: f32[1,96], index: 2, kind: input, shape index: {}]   ;;  %s391_s3 = inlined_call_operand.hbm [shape: f32[16,96], index: 3, kind: output, shape index: {}]  }
   0x1   :  { %9 = vsyncpa [#allocation6], 0 }
   0x2   :  { %10 = vsyncpa [#allocation4], 0  ;;  %s298_s12 = smov [#allocation5]   ;;  %s299_s14 = smov [#allocation2]  }
   0x3   :  { %s28_s13 = sshll.u32 %s298_s12, 4  ;;  %s16_s15 = sshll.u32 %s299_s14, 4  ;;  %s29_s13 = int_to_ptr.vmem [resolvable:$true] %s28_s13  ;;  %s324_s15 = int_to_ptr.vmem [resolvable:$true] %s16_s15 }
   0x4   :  { %s204_s18 = scalar_lea.hbm %s389_s1, 512 }
   0x5   :  { %p205_p0 = scmp.ne.s32.totalorder %s389_s1, %s204_s18  ;;  %p208_p1 = scmp.lt.u32.totalorder %s204_s18, %s389_s1 }
   0x7   :  { %p210_p2 = pnand %p208_p1, %p205_p0 }
   0x9   :  { %213 = shalt.err (!%p210_p2)
}
   0xa   :  { %s214_s23 = scalar_lea.vmem %s29_s13, 512  ;;  %p219_p4 = scmp.lt.s32.totalorder %s29_s13, %s29_s13 }
   0xb   :  { %p215_p3 = scmp.ne.s32.totalorder %s29_s13, %s214_s23  ;;  %p220_p5 = scmp.lt.s32.totalorder %s214_s23, %s214_s23 }
   0xd   :  { %p221_p6 = por %p220_p5, %p219_p4 }
   0xf   :  { %p222_p7 = pnand %p221_p6, %p215_p3 }
  0x11   :  { %225 = shalt.err (!%p222_p7)
}
  0x12   :  { %s300_s24 = smov 128   ;;  %s301_s25 = smov 8  }
  0x13   :  { %34 = dma.hbm_to_vmem [thread:$0]  %s389_s1, 512, %s29_s13, [#allocation6], %s300_s24, %s300_s24, %s301_s25  }
  0x14   :  { %s226_s30 = scalar_lea.hbm %s388_s0, 256 }
  0x15   :  { %p227_p8 = scmp.ne.s32.totalorder %s388_s0, %s226_s30  ;;  %p230_p9 = scmp.lt.u32.totalorder %s226_s30, %s388_s0 }
  0x17   :  { %p232_p10 = pnand %p230_p9, %p227_p8 }
  0x19   :  { %235 = shalt.err (!%p232_p10)
}
  0x1a   :  { %s236_s8 = scalar_lea.vmem %s324_s15, 256  ;;  %p241_p12 = scmp.lt.s32.totalorder %s324_s15, %s324_s15 }
  0x1b   :  { %p237_p11 = scmp.ne.s32.totalorder %s324_s15, %s236_s8  ;;  %p242_p13 = scmp.lt.s32.totalorder %s236_s8, %s236_s8 }
  0x1d   :  { %p243_p0 = por %p242_p13, %p241_p12 }
  0x1f   :  { %p244_p1 = pnand %p243_p0, %p237_p11 }
  0x21   :  { %247 = shalt.err (!%p244_p1)
}
  0x22   :  { %22 = dma.hbm_to_vmem [thread:$0]  %s388_s0, 256, %s324_s15, [#allocation3], %s300_s24, %s300_s24, %s301_s25  }
  0x23   :  { %s302_s10 = smov [#allocation7]   ;;  %s248_s14 = scalar_lea.hbm %s390_s2, 16 }
  0x24   :  { %s41_s11 = sshll.u32 %s302_s10, 4  ;;  %p249_p2 = scmp.ne.s32.totalorder %s390_s2, %s248_s14  ;;  %s42_s11 = int_to_ptr.vmem [resolvable:$true] %s41_s11 }
  0x25   :  { %p252_p3 = scmp.lt.u32.totalorder %s248_s14, %s390_s2 }
  0x27   :  { %p254_p4 = pnand %p252_p3, %p249_p2 }
  0x29   :  { %257 = shalt.err (!%p254_p4)
}
  0x2a   :  { %s258_s20 = scalar_lea.vmem %s42_s11, 16  ;;  %s262_s0 = scalar_lea.vmem %s42_s11, 32 }
  0x2b   :  { %p259_p5 = scmp.ne.s32.totalorder %s42_s11, %s258_s20  ;;  %p263_p6 = scmp.lt.s32.totalorder %s42_s11, %s42_s11 }
  0x2c   :  { %p264_p7 = scmp.lt.s32.totalorder %s262_s0, %s258_s20 }
  0x2e   :  { %p265_p8 = por %p264_p7, %p263_p6 }
  0x30   :  { %p266_p9 = pnand %p265_p8, %p259_p5 }
  0x32   :  { %269 = shalt.err (!%p266_p9)
}
  0x33   :  { %44 = dma.hbm_to_vmem [thread:$0]  %s390_s2, 16, %s42_s11, [#allocation6]  }
  0x34   :  { %292 = dma.done.wait [#allocation3], 256  }
  0x35   :  { %293 = vsyncadd [#allocation3], 4294967040 }
  0x36   :  { %294 = dma.done.wait [#allocation6], 528  }
  0x37   :  { %295 = vsyncadd [#allocation6], 4294966768  ;;  %vm67_vm0 = vcmask 261120   ;;  %v56_v0 = vld [vmem:[#allocation5] sm:$0xff]  ;;  %v57_v1 = vld [vmem:[#allocation5 + $0x8] sm:$0xff]  ;;  %s303_s2 = smov [#allocation8]  }
  0x38   :  { %v58_v2 = vld [vmem:[#allocation5 + $0x10] sm:$0xff]  ;;  %v190_v3 = vpack.c.bf16 %v57_v1, %v56_v0  ;;  %v59_v4 = vld [vmem:[#allocation5 + $0x18] sm:$0xff]  ;;  %v170_v8 = vld [vmem:[#allocation7] ss:$0 sm:$0xff]  ;;  %s157_s22 = sshll.u32 %s303_s2, 4  ;;  %vm149_vm1 = vcmask 785408   ;;  %s158_s22 = int_to_ptr.vmem [resolvable:$true] %s157_s22 }
  0x39   :  { %v54_v5 = vld [vmem:[#allocation2] sm:$0xff]  ;;  %v194_v6 = vpack.c.bf16 %v59_v4, %v58_v2  ;;  %v55_v7 = vld [vmem:[#allocation2 + $0x8] sm:$0xff]  ;;  %s270_s23 = scalar_lea.vmem %s158_s22, 256  ;;  %p275_p11 = scmp.lt.s32.totalorder %s158_s22, %s158_s22 }
  0x3a   :  { %187 = vmatprep.mubr.msk.f32.mxu0 %vm67_vm0, %v54_v5  ;;  %191 = vmatprep.subr.bf16.mxu0 %v190_v3  ;;  %p271_p10 = scmp.ne.s32.totalorder %s158_s22, %s270_s23  ;;  %p276_p12 = scmp.lt.s32.totalorder %s270_s23, %s270_s23 }
  0x3b   :  { %193 = vmatpush3.bf16.msra.mxu0 %v190_v3 }
  0x3c   :  { %195 = vmatprep.subr.bf16.mxu0 %v194_v6  ;;  %p277_p13 = por %p276_p12, %p275_p11 }
  0x3e   :  { %p278_p0 = pnand %p277_p13, %p271_p10 }
  0x3f   :  { %197 = vmatpush3.bf16.msra.mxu0 %v194_v6 }
  0x42   :  { %188 = vmatmul.mubr.msk.f32.vlgmr.msra.gmra.mrb[0].mxu0 %vm67_vm0, %v55_v7 }
 0x115   :  { %v189_v9 = vpop.f32.mrb[0].mxu0 }
 0x116   :  { %v146_v10 = vadd.f32 %v189_v9, %v170_v8  ;;  %v140_v11 = vpop.f32.mrb[1].mxu0 }
 0x117   :  { %v141_v12 = vadd.f32 %v170_v8, %v140_v11 }
 0x118   :  { %151 = vst.msk [vmem:[#allocation8 + $0x8] sm:$0xff] %vm149_vm1, %v146_v10 }
 0x119   :  { %150 = vst.msk [vmem:[#allocation8] sm:$0xff] %vm149_vm1, %v141_v12 }
 0x11a   :  { %281 = shalt.err (!%p278_p0)
}
 0x11b   :  { %s282_s28 = scalar_lea.hbm %s391_s3, 256 }
 0x11c   :  { %p283_p1 = scmp.ne.s32.totalorder %s391_s3, %s282_s28  ;;  %p286_p2 = scmp.lt.u32.totalorder %s282_s28, %s391_s3 }
 0x11e   :  { %p288_p3 = pnand %p286_p2, %p283_p1 }
 0x120   :  { %291 = shalt.err (!%p288_p3)
}
 0x121   :  { %163 = dma.vmem_to_hbm [thread:$0]  %s158_s22, 256, %s391_s3, [#allocation4], %s300_s24, %s300_s24, %s301_s25  }
 0x122   :  { %296 = dma.done.wait [#allocation4], 256  }
 0x123   :  { %297 = vsyncadd [#allocation4], 4294967040 }
 0x124   :  { %167 = vsyncpa [#allocation3], 1 }
 0x125   :  { %168 = vsyncpa [#allocation6], 1 }
 0x126   :  { %169 = vsyncpa [#allocation4], 1 }

// kernel: tpu_custom_call.1
= control target key start
LH: loop header
LB: loop body
LE: loop exit
PB: predicated region body
PF: predicated region fallthrough
CT: control target
= control target key end

     0   :  { %8 = vsyncpa [#allocation3], 0  ;;  %s388_s0 = inlined_call_operand.hbm [shape: f32[16,32], index: 0, kind: input, shape index: {}]   ;;  %s389_s1 = inlined_call_operand.hbm [shape: f32[32,96], index: 1, kind: input, shape index: {}]   ;;  %s390_s2 = inlined_call_operand.hbm [shape: f32[1,96], index: 2, kind: input, shape index: {}]   ;;  %s391_s3 = inlined_call_operand.hbm [shape: f32[16,96], index: 3, kind: output, shape index: {}]  }
   0x1   :  { %9 = vsyncpa [#allocation6], 0 }
   0x2   :  { %10 = vsyncpa [#allocation4], 0  ;;  %s298_s12 = smov [#allocation5]   ;;  %s299_s14 = smov [#allocation2]  }
   0x3   :  { %s28_s13 = sshll.u32 %s298_s12, 4  ;;  %s16_s15 = sshll.u32 %s299_s14, 4  ;;  %s29_s13 = int_to_ptr.vmem [resolvable:$true] %s28_s13  ;;  %s324_s15 = int_to_ptr.vmem [resolvable:$true] %s16_s15 }
   0x4   :  { %s204_s18 = scalar_lea.hbm %s389_s1, 512 }
   0x5   :  { %p205_p0 = scmp.ne.s32.totalorder %s389_s1, %s204_s18  ;;  %p208_p1 = scmp.lt.u32.totalorder %s204_s18, %s389_s1 }
   0x7   :  { %p210_p2 = pnand %p208_p1, %p205_p0 }
   0x9   :  { %213 = shalt.err (!%p210_p2)
}
   0xa   :  { %s214_s23 = scalar_lea.vmem %s29_s13, 512  ;;  %p219_p4 = scmp.lt.s32.totalorder %s29_s13, %s29_s13 }
   0xb   :  { %p215_p3 = scmp.ne.s32.totalorder %s29_s13, %s214_s23  ;;  %p220_p5 = scmp.lt.s32.totalorder %s214_s23, %s214_s23 }
   0xd   :  { %p221_p6 = por %p220_p5, %p219_p4 }
   0xf   :  { %p222_p7 = pnand %p221_p6, %p215_p3 }
  0x11   :  { %225 = shalt.err (!%p222_p7)
}
  0x12   :  { %s300_s24 = smov 128   ;;  %s301_s25 = smov 8  }
  0x13   :  { %34 = dma.hbm_to_vmem [thread:$0]  %s389_s1, 512, %s29_s13, [#allocation6], %s300_s24, %s300_s24, %s301_s25  }
  0x14   :  { %s226_s30 = scalar_lea.hbm %s388_s0, 256 }
  0x15   :  { %p227_p8 = scmp.ne.s32.totalorder %s388_s0, %s226_s30  ;;  %p230_p9 = scmp.lt.u32.totalorder %s226_s30, %s388_s0 }
  0x17   :  { %p232_p10 = pnand %p230_p9, %p227_p8 }
  0x19   :  { %235 = shalt.err (!%p232_p10)
}
  0x1a   :  { %s236_s8 = scalar_lea.vmem %s324_s15, 256  ;;  %p241_p12 = scmp.lt.s32.totalorder %s324_s15, %s324_s15 }
  0x1b   :  { %p237_p11 = scmp.ne.s32.totalorder %s324_s15, %s236_s8  ;;  %p242_p13 = scmp.lt.s32.totalorder %s236_s8, %s236_s8 }
  0x1d   :  { %p243_p0 = por %p242_p13, %p241_p12 }
  0x1f   :  { %p244_p1 = pnand %p243_p0, %p237_p11 }
  0x21   :  { %247 = shalt.err (!%p244_p1)
}
  0x22   :  { %22 = dma.hbm_to_vmem [thread:$0]  %s388_s0, 256, %s324_s15, [#allocation3], %s300_s24, %s300_s24, %s301_s25  }
  0x23   :  { %s302_s10 = smov [#allocation7]   ;;  %s248_s14 = scalar_lea.hbm %s390_s2, 16 }
  0x24   :  { %s41_s11 = sshll.u32 %s302_s10, 4  ;;  %p249_p2 = scmp.ne.s32.totalorder %s390_s2, %s248_s14  ;;  %s42_s11 = int_to_ptr.vmem [resolvable:$true] %s41_s11 }
  0x25   :  { %p252_p3 = scmp.lt.u32.totalorder %s248_s14, %s390_s2 }
  0x27   :  { %p254_p4 = pnand %p252_p3, %p249_p2 }
  0x29   :  { %257 = shalt.err (!%p254_p4)
}
  0x2a   :  { %s258_s20 = scalar_lea.vmem %s42_s11, 16  ;;  %s262_s0 = scalar_lea.vmem %s42_s11, 32 }
  0x2b   :  { %p259_p5 = scmp.ne.s32.totalorder %s42_s11, %s258_s20  ;;  %p263_p6 = scmp.lt.s32.totalorder %s42_s11, %s42_s11 }
  0x2c   :  { %p264_p7 = scmp.lt.s32.totalorder %s262_s0, %s258_s20 }
  0x2e   :  { %p265_p8 = por %p264_p7, %p263_p6 }
  0x30   :  { %p266_p9 = pnand %p265_p8, %p259_p5 }
  0x32   :  { %269 = shalt.err (!%p266_p9)
}
  0x33   :  { %44 = dma.hbm_to_vmem [thread:$0]  %s390_s2, 16, %s42_s11, [#allocation6]  }
  0x34   :  { %292 = dma.done.wait [#allocation3], 256  }
  0x35   :  { %293 = vsyncadd [#allocation3], 4294967040 }
  0x36   :  { %294 = dma.done.wait [#allocation6], 528  }
  0x37   :  { %295 = vsyncadd [#allocation6], 4294966768  ;;  %vm67_vm0 = vcmask 261120   ;;  %v56_v0 = vld [vmem:[#allocation5] sm:$0xff]  ;;  %v57_v1 = vld [vmem:[#allocation5 + $0x8] sm:$0xff]  ;;  %s303_s2 = smov [#allocation8]  }
  0x38   :  { %v58_v2 = vld [vmem:[#allocation5 + $0x10] sm:$0xff]  ;;  %v190_v3 = vpack.c.bf16 %v57_v1, %v56_v0  ;;  %v59_v4 = vld [vmem:[#allocation5 + $0x18] sm:$0xff]  ;;  %v170_v8 = vld [vmem:[#allocation7] ss:$0 sm:$0xff]  ;;  %s157_s22 = sshll.u32 %s303_s2, 4  ;;  %vm149_vm1 = vcmask 785408   ;;  %s158_s22 = int_to_ptr.vmem [resolvable:$true] %s157_s22 }
  0x39   :  { %v54_v5 = vld [vmem:[#allocation2] sm:$0xff]  ;;  %v194_v6 = vpack.c.bf16 %v59_v4, %v58_v2  ;;  %v55_v7 = vld [vmem:[#allocation2 + $0x8] sm:$0xff]  ;;  %s270_s23 = scalar_lea.vmem %s158_s22, 256  ;;  %p275_p11 = scmp.lt.s32.totalorder %s158_s22, %s158_s22 }
  0x3a   :  { %187 = vmatprep.mubr.msk.f32.mxu0 %vm67_vm0, %v54_v5  ;;  %191 = vmatprep.subr.bf16.mxu0 %v190_v3  ;;  %p271_p10 = scmp.ne.s32.totalorder %s158_s22, %s270_s23  ;;  %p276_p12 = scmp.lt.s32.totalorder %s270_s23, %s270_s23 }
  0x3b   :  { %193 = vmatpush3.bf16.msra.mxu0 %v190_v3 }
  0x3c   :  { %195 = vmatprep.subr.bf16.mxu0 %v194_v6  ;;  %p277_p13 = por %p276_p12, %p275_p11 }
  0x3e   :  { %p278_p0 = pnand %p277_p13, %p271_p10 }
  0x3f   :  { %197 = vmatpush3.bf16.msra.mxu0 %v194_v6 }
  0x42   :  { %188 = vmatmul.mubr.msk.f32.vlgmr.msra.gmra.mrb[0].mxu0 %vm67_vm0, %v55_v7 }
 0x115   :  { %v189_v9 = vpop.f32.mrb[0].mxu0 }
 0x116   :  { %v146_v10 = vadd.f32 %v189_v9, %v170_v8  ;;  %v140_v11 = vpop.f32.mrb[1].mxu0 }
 0x117   :  { %v141_v12 = vadd.f32 %v170_v8, %v140_v11 }
 0x118   :  { %151 = vst.msk [vmem:[#allocation8 + $0x8] sm:$0xff] %vm149_vm1, %v146_v10 }
 0x119   :  { %150 = vst.msk [vmem:[#allocation8] sm:$0xff] %vm149_vm1, %v141_v12 }
 0x11a   :  { %281 = shalt.err (!%p278_p0)
}
 0x11b   :  { %s282_s28 = scalar_lea.hbm %s391_s3, 256 }
 0x11c   :  { %p283_p1 = scmp.ne.s32.totalorder %s391_s3, %s282_s28  ;;  %p286_p2 = scmp.lt.u32.totalorder %s282_s28, %s391_s3 }
 0x11e   :  { %p288_p3 = pnand %p286_p2, %p283_p1 }
 0x120   :  { %291 = shalt.err (!%p288_p3)
}
 0x121   :  { %163 = dma.vmem_to_hbm [thread:$0]  %s158_s22, 256, %s391_s3, [#allocation4], %s300_s24, %s300_s24, %s301_s25  }
 0x122   :  { %296 = dma.done.wait [#allocation4], 256  }
 0x123   :  { %297 = vsyncadd [#allocation4], 4294967040 }
 0x124   :  { %167 = vsyncpa [#allocation3], 1 }
 0x125   :  { %168 = vsyncpa [#allocation6], 1 }
 0x126   :  { %169 = vsyncpa [#allocation4], 1 }

</bundles_post_ra>
